<compile_context>
chip_gen: v7x
topology: tpu7x:2x2x1
jax: 0.10.0
libtpu: 0.0.40
codegen_flags: <defaults>
</compile_context>

<pallas_src>
import math
from functools import partial

import jax
import jax.numpy as jnp
from jax.experimental import pallas as pl
from jax.experimental.pallas import tpu as pltpu

E = 4              # embed_dim
H = 2              # num_heads
HD = E // H        # head_dim
HIDDEN = 4 * 3     # linear1 out features
LN_EPS = 1e-5

# ---- packed-weight column layout: wmat has shape (2E, 2E + HIDDEN + E) = (8, 24) ----
_WQ_T = (0, E)                                  # rows 0:E  -> Wq^T   (E, E)
_WO_T = (E, 2 * E)                              # rows 0:E  -> Wo^T   (E, E)
_W1_T = (2 * E, 2 * E + HIDDEN)                 # rows 0:E  -> W1^T   (E, HIDDEN)
_WKV = (2 * E + HIDDEN, 2 * E + HIDDEN + E)     # rows 0:2E -> [Wk; Wv] (2E, E) (untransposed)
_WMAT_COLS = 2 * E + HIDDEN + E

# ---- packed-vector layout: bvec has shape (2E, 16) ----
# row 0: bq, row 1: bo, row 2: ln_gamma, row 3: ln_beta (cols 0:E)
# row 4: b1 (cols 0:HIDDEN)
# col 15 (all 2E rows): [bk; bv] stored as a column
_BVEC_COLS = 16


def _transformer_block_kernel(x_ref,     # (N, E)   tokens, row-major   (N = B*L)
                              xt_ref,    # (E, N)   tokens, column-major
                              wm_ref,    # (2E, _WMAT_COLS) packed weight matrices
                              bv_ref,    # (2E, _BVEC_COLS) packed bias/affine vectors
                              o_ref,     # (N, HIDDEN)
                              *, batch, seq):
    x = x_ref[...]
    xt = xt_ref[...]
    wm = wm_ref[...]
    bv = bv_ref[...]

    wq_t = wm[0:E, _WQ_T[0]:_WQ_T[1]]            # (E, E)
    wo_t = wm[0:E, _WO_T[0]:_WO_T[1]]            # (E, E)
    w1_t = wm[0:E, _W1_T[0]:_W1_T[1]]            # (E, HIDDEN)
    wkv = wm[:, _WKV[0]:_WKV[1]]                 # (2E, E)

    bq = bv[0:1, 0:E]                            # (1, E)
    bo = bv[1:2, 0:E]                            # (1, E)
    ln_w = bv[2:3, 0:E]                          # (1, E)
    ln_b = bv[3:4, 0:E]                          # (1, E)
    b1 = bv[4:5, 0:HIDDEN]                       # (1, HIDDEN)
    bkv = bv[:, _BVEC_COLS - 1:_BVEC_COLS]       # (2E, 1) column

    # ---- Q projection (row-major): q = x @ Wq^T + bq.  K = E = 4 -> unrolled VPU FMAs.
    q = x[:, 0:1] * wq_t[0:1, :]
    for c in range(1, E):
        q = q + x[:, c:c + 1] * wq_t[c:c + 1, :]
    q = q + bq                                   # (N, E)

    # ---- K/V projection directly in (feature, token) layout: kv^T = [Wk; Wv] @ x^T + bkv.
    kvt = wkv[:, 0:1] * xt[0:1, :]
    for c in range(1, E):
        kvt = kvt + wkv[:, c:c + 1] * xt[c:c + 1, :]
    kvt = kvt + bkv                              # (2E, N): rows 0:E = k^T, rows E:2E = v^T

    scale = 1.0 / math.sqrt(HD)

    # ---- per-batch attention with the out-projection fused per head column
    #      (heads are never materialized / concatenated).
    proj_rows = []
    for b in range(batch):
        r0 = b * seq
        qb = q[r0:r0 + seq, :]                   # (L, E)
        kvb = kvt[:, r0:r0 + seq]                # (2E, L)
        ob = None
        for h in range(H):
            c0 = h * HD
            # scores s[i, j] = scale * sum_d q[i, c0+d] * k[j, c0+d]  (outer-product FMAs)
            s = qb[:, c0:c0 + 1] * kvb[c0:c0 + 1, :]
            for d in range(1, HD):
                s = s + qb[:, c0 + d:c0 + d + 1] * kvb[c0 + d:c0 + d + 1, :]
            s = s * scale                        # (L, L)
            # softmax over keys (lane axis): max/sum on XLU, exp + approx recip on EUP.
            s = s - jnp.max(s, axis=-1, keepdims=True)
            p = jnp.exp(s)
            p = p * pl.reciprocal(jnp.sum(p, axis=-1, keepdims=True), approx=True)
            # head output column d folded straight into the out-projection accumulator.
            for d in range(HD):
                vrow = kvb[E + c0 + d:E + c0 + d + 1, :]             # (1, L) == v[:, c0+d]^T
                hcol = jnp.sum(p * vrow, axis=-1, keepdims=True)     # (L, 1)
                contrib = hcol * wo_t[c0 + d:c0 + d + 1, :]          # (L, E)
                ob = contrib if ob is None else ob + contrib
        proj_rows.append(ob)

    proj = jnp.concatenate(proj_rows, axis=0) + bo                   # (N, E)

    # ---- dropout1: identity (eval semantics).
    # TODO(synk): training-mode stochastic dropout (p=0.1) intentionally omitted.

    # ---- LayerNorm(E): biased variance, eps inside rsqrt (PyTorch semantics).
    mu = jnp.mean(proj, axis=-1, keepdims=True)
    ctr = proj - mu
    var = jnp.mean(ctr * ctr, axis=-1, keepdims=True)
    xn = ctr * jax.lax.rsqrt(var + LN_EPS)
    xn = xn * ln_w + ln_b

    # ---- ReLU.
    xr = jnp.maximum(xn, 0.0)

    # ---- linear1: (N, E) -> (N, HIDDEN).  K = E = 4 -> unrolled VPU FMAs.
    y = xr[:, 0:1] * w1_t[0:1, :]
    for c in range(1, E):
        y = y + xr[:, c:c + 1] * w1_t[c:c + 1, :]
    y = y + b1

    o_ref[...] = y.astype(o_ref.dtype)


def _pack_params(params):
    """Pack the 9 parameter tensors into 2 small VMEM operands (host-side, free)."""
    wqkv = params["wqkv"]                       # (3E, E) in_proj_weight
    bqkv = params["bqkv"].reshape(3 * E)        # (3E,)   in_proj_bias

    wmat = jnp.zeros((2 * E, _WMAT_COLS), jnp.float32)
    wmat = wmat.at[0:E, _WQ_T[0]:_WQ_T[1]].set(wqkv[0:E, :].T)
    wmat = wmat.at[0:E, _WO_T[0]:_WO_T[1]].set(params["wo"].T)
    wmat = wmat.at[0:E, _W1_T[0]:_W1_T[1]].set(params["w1"].T)
    wmat = wmat.at[:, _WKV[0]:_WKV[1]].set(wqkv[E:3 * E, :])

    bvec = jnp.zeros((2 * E, _BVEC_COLS), jnp.float32)
    bvec = bvec.at[0, 0:E].set(bqkv[0:E])
    bvec = bvec.at[1, 0:E].set(params["bo"].reshape(E))
    bvec = bvec.at[2, 0:E].set(params["ln_w"].reshape(E))
    bvec = bvec.at[3, 0:E].set(params["ln_b"].reshape(E))
    bvec = bvec.at[4, 0:HIDDEN].set(params["b1"].reshape(HIDDEN))
    bvec = bvec.at[:, _BVEC_COLS - 1].set(bqkv[E:3 * E])
    return wmat, bvec


@jax.jit
def transformer_block(x, params):
    """x: (B, L, E) float32; params: dict of weights (see init_params)."""
    B, L, _ = x.shape
    N = B * L
    x2d = x.reshape(N, E)
    xt = x2d.T                                  # layout plumbing done outside the kernel
    wmat, bvec = _pack_params(params)

    out2d = pl.pallas_call(
        partial(_transformer_block_kernel, batch=B, seq=L),
        out_shape=jax.ShapeDtypeStruct((N, HIDDEN), x.dtype),
        grid=(1,),                              # single step: whole problem fits in VMEM
        in_specs=[
            pl.BlockSpec((N, E), lambda i: (0, 0)),
            pl.BlockSpec((E, N), lambda i: (0, 0)),
            pl.BlockSpec((2 * E, _WMAT_COLS), lambda i: (0, 0)),
            pl.BlockSpec((2 * E, _BVEC_COLS), lambda i: (0, 0)),
        ],
        out_specs=pl.BlockSpec((N, HIDDEN), lambda i: (0, 0)),
        compiler_params=pltpu.CompilerParams(
            dimension_semantics=("arbitrary",)),
    )(x2d, xt, wmat, bvec)
    return out2d.reshape(B, L, HIDDEN)


def init_params(key):
    """Deterministic synthetic parameters with the same shapes as the PyTorch module."""
    ks = jax.random.split(key, 8)
    f32 = jnp.float32
    return {
        # nn.MultiheadAttention(embed_dim=4, num_heads=2)
        "wqkv": 0.3 * jax.random.normal(ks[0], (3 * E, E), f32),   # in_proj_weight
        "bqkv": 0.1 * jax.random.normal(ks[1], (1, 3 * E), f32),   # in_proj_bias
        "wo":   0.3 * jax.random.normal(ks[2], (E, E), f32),       # out_proj.weight
        "bo":   0.1 * jax.random.normal(ks[3], (1, E), f32),       # out_proj.bias
        # nn.LayerNorm(4)
        "ln_w": 1.0 + 0.1 * jax.random.normal(ks[4], (1, E), f32),
        "ln_b": 0.1 * jax.random.normal(ks[5], (1, E), f32),
        # nn.Linear(4, 12)
        "w1":   0.3 * jax.random.normal(ks[6], (HIDDEN, E), f32),
        "b1":   0.1 * jax.random.normal(ks[7], (1, HIDDEN), f32),
    }


def _reference(x, params):
    """Pure-JAX reference matching the PyTorch module (eval mode)."""
    B, L, _ = x.shape
    qkv = jnp.einsum("ble,fe->blf", x, params["wqkv"]) + params["bqkv"].reshape(3 * E)
    q, k, v = qkv[..., 0:E], qkv[..., E:2 * E], qkv[..., 2 * E:3 * E]

    def to_heads(t):
        return t.reshape(B, L, H, HD).transpose(0, 2, 1, 3)        # (B, H, L, HD)

    qh, kh, vh = to_heads(q), to_heads(k), to_heads(v)
    s = jnp.einsum("bhld,bhmd->bhlm", qh, kh) / math.sqrt(HD)
    p = jax.nn.softmax(s, axis=-1)
    attn = jnp.einsum("bhlm,bhmd->bhld", p, vh)
    attn = attn.transpose(0, 2, 1, 3).reshape(B, L, E)
    attn = attn @ params["wo"].T + params["bo"].reshape(E)

    mu = attn.mean(-1, keepdims=True)
    var = ((attn - mu) ** 2).mean(-1, keepdims=True)
    out = (attn - mu) / jnp.sqrt(var + LN_EPS)
    out = out * params["ln_w"].reshape(E) + params["ln_b"].reshape(E)
    out = jnp.maximum(out, 0.0)
    out = out @ params["w1"].T + params["b1"].reshape(HIDDEN)
    return out


if __name__ == "__main__":
    key = jax.random.PRNGKey(0)
    k_x, k_p = jax.random.split(key)

    B, L = 2, 8
    x = jax.random.normal(k_x, (B, L, E), jnp.float32)
    params = init_params(k_p)

    out = transformer_block(x, params)
    out = jax.block_until_ready(out)
    assert out.shape == (B, L, HIDDEN), out.shape
    assert bool(jnp.all(jnp.isfinite(out)))

    ref = _reference(x, params)
    max_err = float(jnp.max(jnp.abs(out - ref)))
    # generous bound: only approx-reciprocal softmax normalization differs from the reference
    assert max_err < 1e-1, f"kernel/reference mismatch: max abs err {max_err}"
    print("KERNEL_OK")
</pallas_src>

<mosaic_0001>
module attributes {stable_mosaic.version = 11 : i64} {
  func.func @_transformer_block_kernel(%arg0: i32, %arg1: memref<16x4xf32, #tpu.memory_space<vmem>>, %arg2: memref<4x16xf32, #tpu.memory_space<vmem>>, %arg3: memref<8x24xf32, #tpu.memory_space<vmem>>, %arg4: memref<8x16xf32, #tpu.memory_space<vmem>>, %arg5: memref<16x12xf32, #tpu.memory_space<vmem>>) attributes {dimension_semantics = [#tpu.dimension_semantics<arbitrary>], iteration_bounds = array<i64: 1>, scalar_prefetch = 0 : i64, scratch_operands = 0 : i64, tpu.core_type = #tpu.core_type<tc>, window_params = [{pipeline_mode = #tpu.pipeline_mode<synchronous>, transform_indices = @transform_0, window_bounds = array<i64: 16, 4>}, {pipeline_mode = #tpu.pipeline_mode<synchronous>, transform_indices = @transform_1, window_bounds = array<i64: 4, 16>}, {pipeline_mode = #tpu.pipeline_mode<synchronous>, transform_indices = @transform_2, window_bounds = array<i64: 8, 24>}, {pipeline_mode = #tpu.pipeline_mode<synchronous>, transform_indices = @transform_3, window_bounds = array<i64: 8, 16>}, {pipeline_mode = #tpu.pipeline_mode<synchronous>, transform_indices = @transform_4, window_bounds = array<i64: 16, 12>}]} {
    %c0 = arith.constant 0 : index
    %c0_0 = arith.constant 0 : index
    %0 = vector.load %arg1[%c0, %c0_0] : memref<16x4xf32, #tpu.memory_space<vmem>>, vector<16x4xf32>
    %c0_1 = arith.constant 0 : index
    %c0_2 = arith.constant 0 : index
    %1 = vector.load %arg2[%c0_1, %c0_2] : memref<4x16xf32, #tpu.memory_space<vmem>>, vector<4x16xf32>
    %c0_3 = arith.constant 0 : index
    %c0_4 = arith.constant 0 : index
    %2 = vector.load %arg3[%c0_3, %c0_4] : memref<8x24xf32, #tpu.memory_space<vmem>>, vector<8x24xf32>
    %c0_5 = arith.constant 0 : index
    %c0_6 = arith.constant 0 : index
    %3 = vector.load %arg4[%c0_5, %c0_6] : memref<8x16xf32, #tpu.memory_space<vmem>>, vector<8x16xf32>
    %4 = vector.extract_strided_slice %2 {offsets = [0, 0], sizes = [4, 4], strides = [1, 1]} : vector<8x24xf32> to vector<4x4xf32>
    %5 = vector.extract_strided_slice %2 {offsets = [0, 4], sizes = [4, 4], strides = [1, 1]} : vector<8x24xf32> to vector<4x4xf32>
    %6 = vector.extract_strided_slice %2 {offsets = [0, 8], sizes = [4, 12], strides = [1, 1]} : vector<8x24xf32> to vector<4x12xf32>
    %7 = vector.extract_strided_slice %2 {offsets = [0, 20], sizes = [8, 4], strides = [1, 1]} : vector<8x24xf32> to vector<8x4xf32>
    %8 = vector.extract_strided_slice %3 {offsets = [0, 0], sizes = [1, 4], strides = [1, 1]} : vector<8x16xf32> to vector<1x4xf32>
    %9 = vector.extract_strided_slice %3 {offsets = [1, 0], sizes = [1, 4], strides = [1, 1]} : vector<8x16xf32> to vector<1x4xf32>
    %10 = vector.extract_strided_slice %3 {offsets = [2, 0], sizes = [1, 4], strides = [1, 1]} : vector<8x16xf32> to vector<1x4xf32>
    %11 = vector.extract_strided_slice %3 {offsets = [3, 0], sizes = [1, 4], strides = [1, 1]} : vector<8x16xf32> to vector<1x4xf32>
    %12 = vector.extract_strided_slice %3 {offsets = [4, 0], sizes = [1, 12], strides = [1, 1]} : vector<8x16xf32> to vector<1x12xf32>
    %13 = vector.extract_strided_slice %3 {offsets = [0, 15], sizes = [8, 1], strides = [1, 1]} : vector<8x16xf32> to vector<8x1xf32>
    %14 = vector.extract_strided_slice %0 {offsets = [0, 0], sizes = [16, 1], strides = [1, 1]} : vector<16x4xf32> to vector<16x1xf32>
    %15 = vector.extract_strided_slice %4 {offsets = [0, 0], sizes = [1, 4], strides = [1, 1]} : vector<4x4xf32> to vector<1x4xf32>
    %16 = vector.broadcast %14 : vector<16x1xf32> to vector<16x4xf32>
    %17 = vector.broadcast %15 : vector<1x4xf32> to vector<16x4xf32>
    %18 = arith.mulf %16, %17 : vector<16x4xf32>
    %19 = vector.extract_strided_slice %0 {offsets = [0, 1], sizes = [16, 1], strides = [1, 1]} : vector<16x4xf32> to vector<16x1xf32>
    %20 = vector.extract_strided_slice %4 {offsets = [1, 0], sizes = [1, 4], strides = [1, 1]} : vector<4x4xf32> to vector<1x4xf32>
    %21 = vector.broadcast %19 : vector<16x1xf32> to vector<16x4xf32>
    %22 = vector.broadcast %20 : vector<1x4xf32> to vector<16x4xf32>
    %23 = arith.mulf %21, %22 : vector<16x4xf32>
    %24 = arith.addf %18, %23 : vector<16x4xf32>
    %25 = vector.extract_strided_slice %0 {offsets = [0, 2], sizes = [16, 1], strides = [1, 1]} : vector<16x4xf32> to vector<16x1xf32>
    %26 = vector.extract_strided_slice %4 {offsets = [2, 0], sizes = [1, 4], strides = [1, 1]} : vector<4x4xf32> to vector<1x4xf32>
    %27 = vector.broadcast %25 : vector<16x1xf32> to vector<16x4xf32>
    %28 = vector.broadcast %26 : vector<1x4xf32> to vector<16x4xf32>
    %29 = arith.mulf %27, %28 : vector<16x4xf32>
    %30 = arith.addf %24, %29 : vector<16x4xf32>
    %31 = vector.extract_strided_slice %0 {offsets = [0, 3], sizes = [16, 1], strides = [1, 1]} : vector<16x4xf32> to vector<16x1xf32>
    %32 = vector.extract_strided_slice %4 {offsets = [3, 0], sizes = [1, 4], strides = [1, 1]} : vector<4x4xf32> to vector<1x4xf32>
    %33 = vector.broadcast %31 : vector<16x1xf32> to vector<16x4xf32>
    %34 = vector.broadcast %32 : vector<1x4xf32> to vector<16x4xf32>
    %35 = arith.mulf %33, %34 : vector<16x4xf32>
    %36 = arith.addf %30, %35 : vector<16x4xf32>
    %37 = vector.broadcast %8 : vector<1x4xf32> to vector<16x4xf32>
    %38 = arith.addf %36, %37 : vector<16x4xf32>
    %39 = vector.extract_strided_slice %7 {offsets = [0, 0], sizes = [8, 1], strides = [1, 1]} : vector<8x4xf32> to vector<8x1xf32>
    %40 = vector.extract_strided_slice %1 {offsets = [0, 0], sizes = [1, 16], strides = [1, 1]} : vector<4x16xf32> to vector<1x16xf32>
    %41 = vector.broadcast %39 : vector<8x1xf32> to vector<8x16xf32>
    %42 = vector.broadcast %40 : vector<1x16xf32> to vector<8x16xf32>
    %43 = arith.mulf %41, %42 : vector<8x16xf32>
    %44 = vector.extract_strided_slice %7 {offsets = [0, 1], sizes = [8, 1], strides = [1, 1]} : vector<8x4xf32> to vector<8x1xf32>
    %45 = vector.extract_strided_slice %1 {offsets = [1, 0], sizes = [1, 16], strides = [1, 1]} : vector<4x16xf32> to vector<1x16xf32>
    %46 = vector.broadcast %44 : vector<8x1xf32> to vector<8x16xf32>
    %47 = vector.broadcast %45 : vector<1x16xf32> to vector<8x16xf32>
    %48 = arith.mulf %46, %47 : vector<8x16xf32>
    %49 = arith.addf %43, %48 : vector<8x16xf32>
    %50 = vector.extract_strided_slice %7 {offsets = [0, 2], sizes = [8, 1], strides = [1, 1]} : vector<8x4xf32> to vector<8x1xf32>
    %51 = vector.extract_strided_slice %1 {offsets = [2, 0], sizes = [1, 16], strides = [1, 1]} : vector<4x16xf32> to vector<1x16xf32>
    %52 = vector.broadcast %50 : vector<8x1xf32> to vector<8x16xf32>
    %53 = vector.broadcast %51 : vector<1x16xf32> to vector<8x16xf32>
    %54 = arith.mulf %52, %53 : vector<8x16xf32>
    %55 = arith.addf %49, %54 : vector<8x16xf32>
    %56 = vector.extract_strided_slice %7 {offsets = [0, 3], sizes = [8, 1], strides = [1, 1]} : vector<8x4xf32> to vector<8x1xf32>
    %57 = vector.extract_strided_slice %1 {offsets = [3, 0], sizes = [1, 16], strides = [1, 1]} : vector<4x16xf32> to vector<1x16xf32>
    %58 = vector.broadcast %56 : vector<8x1xf32> to vector<8x16xf32>
    %59 = vector.broadcast %57 : vector<1x16xf32> to vector<8x16xf32>
    %60 = arith.mulf %58, %59 : vector<8x16xf32>
    %61 = arith.addf %55, %60 : vector<8x16xf32>
    %62 = vector.broadcast %13 : vector<8x1xf32> to vector<8x16xf32>
    %63 = arith.addf %61, %62 : vector<8x16xf32>
    %64 = vector.extract_strided_slice %38 {offsets = [0, 0], sizes = [8, 4], strides = [1, 1]} : vector<16x4xf32> to vector<8x4xf32>
    %65 = vector.extract_strided_slice %63 {offsets = [0, 0], sizes = [8, 8], strides = [1, 1]} : vector<8x16xf32> to vector<8x8xf32>
    %66 = vector.extract_strided_slice %64 {offsets = [0, 0], sizes = [8, 1], strides = [1, 1]} : vector<8x4xf32> to vector<8x1xf32>
    %67 = vector.extract_strided_slice %65 {offsets = [0, 0], sizes = [1, 8], strides = [1, 1]} : vector<8x8xf32> to vector<1x8xf32>
    %68 = vector.broadcast %66 : vector<8x1xf32> to vector<8x8xf32>
    %69 = vector.broadcast %67 : vector<1x8xf32> to vector<8x8xf32>
    %70 = arith.mulf %68, %69 : vector<8x8xf32>
    %71 = vector.extract_strided_slice %64 {offsets = [0, 1], sizes = [8, 1], strides = [1, 1]} : vector<8x4xf32> to vector<8x1xf32>
    %72 = vector.extract_strided_slice %65 {offsets = [1, 0], sizes = [1, 8], strides = [1, 1]} : vector<8x8xf32> to vector<1x8xf32>
    %73 = vector.broadcast %71 : vector<8x1xf32> to vector<8x8xf32>
    %74 = vector.broadcast %72 : vector<1x8xf32> to vector<8x8xf32>
    %75 = arith.mulf %73, %74 : vector<8x8xf32>
    %76 = arith.addf %70, %75 : vector<8x8xf32>
    %cst = arith.constant 0.707106769 : f32
    %77 = vector.broadcast %cst : f32 to vector<8x8xf32>
    %78 = arith.mulf %76, %77 : vector<8x8xf32>
    %cst_7 = arith.constant dense<0xFF800000> : vector<8xf32>
    %79 = vector.multi_reduction <maximumf>, %78, %cst_7 [1] : vector<8x8xf32> to vector<8xf32>
    %80 = vector.shape_cast %79 : vector<8xf32> to vector<8x1xf32>
    %81 = vector.broadcast %80 : vector<8x1xf32> to vector<8x8xf32>
    %82 = arith.subf %78, %81 : vector<8x8xf32>
    %83 = math.exp %82 : vector<8x8xf32>
    %cst_8 = arith.constant dense<0.000000e+00> : vector<8xf32>
    %84 = vector.multi_reduction <add>, %83, %cst_8 [1] : vector<8x8xf32> to vector<8xf32>
    %85 = vector.shape_cast %84 : vector<8xf32> to vector<8x1xf32>
    %86 = tpu.reciprocal %85 {approx = true} : vector<8x1xf32> -> vector<8x1xf32>
    %87 = vector.broadcast %86 : vector<8x1xf32> to vector<8x8xf32>
    %88 = arith.mulf %83, %87 : vector<8x8xf32>
    %89 = vector.extract_strided_slice %65 {offsets = [4, 0], sizes = [1, 8], strides = [1, 1]} : vector<8x8xf32> to vector<1x8xf32>
    %90 = vector.broadcast %89 : vector<1x8xf32> to vector<8x8xf32>
    %91 = arith.mulf %88, %90 : vector<8x8xf32>
    %cst_9 = arith.constant dense<0.000000e+00> : vector<8xf32>
    %92 = vector.multi_reduction <add>, %91, %cst_9 [1] : vector<8x8xf32> to vector<8xf32>
    %93 = vector.shape_cast %92 : vector<8xf32> to vector<8x1xf32>
    %94 = vector.extract_strided_slice %5 {offsets = [0, 0], sizes = [1, 4], strides = [1, 1]} : vector<4x4xf32> to vector<1x4xf32>
    %95 = vector.broadcast %93 : vector<8x1xf32> to vector<8x4xf32>
    %96 = vector.broadcast %94 : vector<1x4xf32> to vector<8x4xf32>
    %97 = arith.mulf %95, %96 : vector<8x4xf32>
    %98 = vector.extract_strided_slice %65 {offsets = [5, 0], sizes = [1, 8], strides = [1, 1]} : vector<8x8xf32> to vector<1x8xf32>
    %99 = vector.broadcast %98 : vector<1x8xf32> to vector<8x8xf32>
    %100 = arith.mulf %88, %99 : vector<8x8xf32>
    %cst_10 = arith.constant dense<0.000000e+00> : vector<8xf32>
    %101 = vector.multi_reduction <add>, %100, %cst_10 [1] : vector<8x8xf32> to vector<8xf32>
    %102 = vector.shape_cast %101 : vector<8xf32> to vector<8x1xf32>
    %103 = vector.extract_strided_slice %5 {offsets = [1, 0], sizes = [1, 4], strides = [1, 1]} : vector<4x4xf32> to vector<1x4xf32>
    %104 = vector.broadcast %102 : vector<8x1xf32> to vector<8x4xf32>
    %105 = vector.broadcast %103 : vector<1x4xf32> to vector<8x4xf32>
    %106 = arith.mulf %104, %105 : vector<8x4xf32>
    %107 = arith.addf %97, %106 : vector<8x4xf32>
    %108 = vector.extract_strided_slice %64 {offsets = [0, 2], sizes = [8, 1], strides = [1, 1]} : vector<8x4xf32> to vector<8x1xf32>
    %109 = vector.extract_strided_slice %65 {offsets = [2, 0], sizes = [1, 8], strides = [1, 1]} : vector<8x8xf32> to vector<1x8xf32>
    %110 = vector.broadcast %108 : vector<8x1xf32> to vector<8x8xf32>
    %111 = vector.broadcast %109 : vector<1x8xf32> to vector<8x8xf32>
    %112 = arith.mulf %110, %111 : vector<8x8xf32>
    %113 = vector.extract_strided_slice %64 {offsets = [0, 3], sizes = [8, 1], strides = [1, 1]} : vector<8x4xf32> to vector<8x1xf32>
    %114 = vector.extract_strided_slice %65 {offsets = [3, 0], sizes = [1, 8], strides = [1, 1]} : vector<8x8xf32> to vector<1x8xf32>
    %115 = vector.broadcast %113 : vector<8x1xf32> to vector<8x8xf32>
    %116 = vector.broadcast %114 : vector<1x8xf32> to vector<8x8xf32>
    %117 = arith.mulf %115, %116 : vector<8x8xf32>
    %118 = arith.addf %112, %117 : vector<8x8xf32>
    %cst_11 = arith.constant 0.707106769 : f32
    %119 = vector.broadcast %cst_11 : f32 to vector<8x8xf32>
    %120 = arith.mulf %118, %119 : vector<8x8xf32>
    %cst_12 = arith.constant dense<0xFF800000> : vector<8xf32>
    %121 = vector.multi_reduction <maximumf>, %120, %cst_12 [1] : vector<8x8xf32> to vector<8xf32>
    %122 = vector.shape_cast %121 : vector<8xf32> to vector<8x1xf32>
    %123 = vector.broadcast %122 : vector<8x1xf32> to vector<8x8xf32>
    %124 = arith.subf %120, %123 : vector<8x8xf32>
    %125 = math.exp %124 : vector<8x8xf32>
    %cst_13 = arith.constant dense<0.000000e+00> : vector<8xf32>
    %126 = vector.multi_reduction <add>, %125, %cst_13 [1] : vector<8x8xf32> to vector<8xf32>
    %127 = vector.shape_cast %126 : vector<8xf32> to vector<8x1xf32>
    %128 = tpu.reciprocal %127 {approx = true} : vector<8x1xf32> -> vector<8x1xf32>
    %129 = vector.broadcast %128 : vector<8x1xf32> to vector<8x8xf32>
    %130 = arith.mulf %125, %129 : vector<8x8xf32>
    %131 = vector.extract_strided_slice %65 {offsets = [6, 0], sizes = [1, 8], strides = [1, 1]} : vector<8x8xf32> to vector<1x8xf32>
    %132 = vector.broadcast %131 : vector<1x8xf32> to vector<8x8xf32>
    %133 = arith.mulf %130, %132 : vector<8x8xf32>
    %cst_14 = arith.constant dense<0.000000e+00> : vector<8xf32>
    %134 = vector.multi_reduction <add>, %133, %cst_14 [1] : vector<8x8xf32> to vector<8xf32>
    %135 = vector.shape_cast %134 : vector<8xf32> to vector<8x1xf32>
    %136 = vector.extract_strided_slice %5 {offsets = [2, 0], sizes = [1, 4], strides = [1, 1]} : vector<4x4xf32> to vector<1x4xf32>
    %137 = vector.broadcast %135 : vector<8x1xf32> to vector<8x4xf32>
    %138 = vector.broadcast %136 : vector<1x4xf32> to vector<8x4xf32>
    %139 = arith.mulf %137, %138 : vector<8x4xf32>
    %140 = arith.addf %107, %139 : vector<8x4xf32>
    %141 = vector.extract_strided_slice %65 {offsets = [7, 0], sizes = [1, 8], strides = [1, 1]} : vector<8x8xf32> to vector<1x8xf32>
    %142 = vector.broadcast %141 : vector<1x8xf32> to vector<8x8xf32>
    %143 = arith.mulf %130, %142 : vector<8x8xf32>
    %cst_15 = arith.constant dense<0.000000e+00> : vector<8xf32>
    %144 = vector.multi_reduction <add>, %143, %cst_15 [1] : vector<8x8xf32> to vector<8xf32>
    %145 = vector.shape_cast %144 : vector<8xf32> to vector<8x1xf32>
    %146 = vector.extract_strided_slice %5 {offsets = [3, 0], sizes = [1, 4], strides = [1, 1]} : vector<4x4xf32> to vector<1x4xf32>
    %147 = vector.broadcast %145 : vector<8x1xf32> to vector<8x4xf32>
    %148 = vector.broadcast %146 : vector<1x4xf32> to vector<8x4xf32>
    %149 = arith.mulf %147, %148 : vector<8x4xf32>
    %150 = arith.addf %140, %149 : vector<8x4xf32>
    %151 = vector.extract_strided_slice %38 {offsets = [8, 0], sizes = [8, 4], strides = [1, 1]} : vector<16x4xf32> to vector<8x4xf32>
    %152 = vector.extract_strided_slice %63 {offsets = [0, 8], sizes = [8, 8], strides = [1, 1]} : vector<8x16xf32> to vector<8x8xf32>
    %153 = vector.extract_strided_slice %151 {offsets = [0, 0], sizes = [8, 1], strides = [1, 1]} : vector<8x4xf32> to vector<8x1xf32>
    %154 = vector.extract_strided_slice %152 {offsets = [0, 0], sizes = [1, 8], strides = [1, 1]} : vector<8x8xf32> to vector<1x8xf32>
    %155 = vector.broadcast %153 : vector<8x1xf32> to vector<8x8xf32>
    %156 = vector.broadcast %154 : vector<1x8xf32> to vector<8x8xf32>
    %157 = arith.mulf %155, %156 : vector<8x8xf32>
    %158 = vector.extract_strided_slice %151 {offsets = [0, 1], sizes = [8, 1], strides = [1, 1]} : vector<8x4xf32> to vector<8x1xf32>
    %159 = vector.extract_strided_slice %152 {offsets = [1, 0], sizes = [1, 8], strides = [1, 1]} : vector<8x8xf32> to vector<1x8xf32>
    %160 = vector.broadcast %158 : vector<8x1xf32> to vector<8x8xf32>
    %161 = vector.broadcast %159 : vector<1x8xf32> to vector<8x8xf32>
    %162 = arith.mulf %160, %161 : vector<8x8xf32>
    %163 = arith.addf %157, %162 : vector<8x8xf32>
    %cst_16 = arith.constant 0.707106769 : f32
    %164 = vector.broadcast %cst_16 : f32 to vector<8x8xf32>
    %165 = arith.mulf %163, %164 : vector<8x8xf32>
    %cst_17 = arith.constant dense<0xFF800000> : vector<8xf32>
    %166 = vector.multi_reduction <maximumf>, %165, %cst_17 [1] : vector<8x8xf32> to vector<8xf32>
    %167 = vector.shape_cast %166 : vector<8xf32> to vector<8x1xf32>
    %168 = vector.broadcast %167 : vector<8x1xf32> to vector<8x8xf32>
    %169 = arith.subf %165, %168 : vector<8x8xf32>
    %170 = math.exp %169 : vector<8x8xf32>
    %cst_18 = arith.constant dense<0.000000e+00> : vector<8xf32>
    %171 = vector.multi_reduction <add>, %170, %cst_18 [1] : vector<8x8xf32> to vector<8xf32>
    %172 = vector.shape_cast %171 : vector<8xf32> to vector<8x1xf32>
    %173 = tpu.reciprocal %172 {approx = true} : vector<8x1xf32> -> vector<8x1xf32>
    %174 = vector.broadcast %173 : vector<8x1xf32> to vector<8x8xf32>
    %175 = arith.mulf %170, %174 : vector<8x8xf32>
    %176 = vector.extract_strided_slice %152 {offsets = [4, 0], sizes = [1, 8], strides = [1, 1]} : vector<8x8xf32> to vector<1x8xf32>
    %177 = vector.broadcast %176 : vector<1x8xf32> to vector<8x8xf32>
    %178 = arith.mulf %175, %177 : vector<8x8xf32>
    %cst_19 = arith.constant dense<0.000000e+00> : vector<8xf32>
    %179 = vector.multi_reduction <add>, %178, %cst_19 [1] : vector<8x8xf32> to vector<8xf32>
    %180 = vector.shape_cast %179 : vector<8xf32> to vector<8x1xf32>
    %181 = vector.extract_strided_slice %5 {offsets = [0, 0], sizes = [1, 4], strides = [1, 1]} : vector<4x4xf32> to vector<1x4xf32>
    %182 = vector.broadcast %180 : vector<8x1xf32> to vector<8x4xf32>
    %183 = vector.broadcast %181 : vector<1x4xf32> to vector<8x4xf32>
    %184 = arith.mulf %182, %183 : vector<8x4xf32>
    %185 = vector.extract_strided_slice %152 {offsets = [5, 0], sizes = [1, 8], strides = [1, 1]} : vector<8x8xf32> to vector<1x8xf32>
    %186 = vector.broadcast %185 : vector<1x8xf32> to vector<8x8xf32>
    %187 = arith.mulf %175, %186 : vector<8x8xf32>
    %cst_20 = arith.constant dense<0.000000e+00> : vector<8xf32>
    %188 = vector.multi_reduction <add>, %187, %cst_20 [1] : vector<8x8xf32> to vector<8xf32>
    %189 = vector.shape_cast %188 : vector<8xf32> to vector<8x1xf32>
    %190 = vector.extract_strided_slice %5 {offsets = [1, 0], sizes = [1, 4], strides = [1, 1]} : vector<4x4xf32> to vector<1x4xf32>
    %191 = vector.broadcast %189 : vector<8x1xf32> to vector<8x4xf32>
    %192 = vector.broadcast %190 : vector<1x4xf32> to vector<8x4xf32>
    %193 = arith.mulf %191, %192 : vector<8x4xf32>
    %194 = arith.addf %184, %193 : vector<8x4xf32>
    %195 = vector.extract_strided_slice %151 {offsets = [0, 2], sizes = [8, 1], strides = [1, 1]} : vector<8x4xf32> to vector<8x1xf32>
    %196 = vector.extract_strided_slice %152 {offsets = [2, 0], sizes = [1, 8], strides = [1, 1]} : vector<8x8xf32> to vector<1x8xf32>
    %197 = vector.broadcast %195 : vector<8x1xf32> to vector<8x8xf32>
    %198 = vector.broadcast %196 : vector<1x8xf32> to vector<8x8xf32>
    %199 = arith.mulf %197, %198 : vector<8x8xf32>
    %200 = vector.extract_strided_slice %151 {offsets = [0, 3], sizes = [8, 1], strides = [1, 1]} : vector<8x4xf32> to vector<8x1xf32>
    %201 = vector.extract_strided_slice %152 {offsets = [3, 0], sizes = [1, 8], strides = [1, 1]} : vector<8x8xf32> to vector<1x8xf32>
    %202 = vector.broadcast %200 : vector<8x1xf32> to vector<8x8xf32>
    %203 = vector.broadcast %201 : vector<1x8xf32> to vector<8x8xf32>
    %204 = arith.mulf %202, %203 : vector<8x8xf32>
    %205 = arith.addf %199, %204 : vector<8x8xf32>
    %cst_21 = arith.constant 0.707106769 : f32
    %206 = vector.broadcast %cst_21 : f32 to vector<8x8xf32>
    %207 = arith.mulf %205, %206 : vector<8x8xf32>
    %cst_22 = arith.constant dense<0xFF800000> : vector<8xf32>
    %208 = vector.multi_reduction <maximumf>, %207, %cst_22 [1] : vector<8x8xf32> to vector<8xf32>
    %209 = vector.shape_cast %208 : vector<8xf32> to vector<8x1xf32>
    %210 = vector.broadcast %209 : vector<8x1xf32> to vector<8x8xf32>
    %211 = arith.subf %207, %210 : vector<8x8xf32>
    %212 = math.exp %211 : vector<8x8xf32>
    %cst_23 = arith.constant dense<0.000000e+00> : vector<8xf32>
    %213 = vector.multi_reduction <add>, %212, %cst_23 [1] : vector<8x8xf32> to vector<8xf32>
    %214 = vector.shape_cast %213 : vector<8xf32> to vector<8x1xf32>
    %215 = tpu.reciprocal %214 {approx = true} : vector<8x1xf32> -> vector<8x1xf32>
    %216 = vector.broadcast %215 : vector<8x1xf32> to vector<8x8xf32>
    %217 = arith.mulf %212, %216 : vector<8x8xf32>
    %218 = vector.extract_strided_slice %152 {offsets = [6, 0], sizes = [1, 8], strides = [1, 1]} : vector<8x8xf32> to vector<1x8xf32>
    %219 = vector.broadcast %218 : vector<1x8xf32> to vector<8x8xf32>
    %220 = arith.mulf %217, %219 : vector<8x8xf32>
    %cst_24 = arith.constant dense<0.000000e+00> : vector<8xf32>
    %221 = vector.multi_reduction <add>, %220, %cst_24 [1] : vector<8x8xf32> to vector<8xf32>
    %222 = vector.shape_cast %221 : vector<8xf32> to vector<8x1xf32>
    %223 = vector.extract_strided_slice %5 {offsets = [2, 0], sizes = [1, 4], strides = [1, 1]} : vector<4x4xf32> to vector<1x4xf32>
    %224 = vector.broadcast %222 : vector<8x1xf32> to vector<8x4xf32>
    %225 = vector.broadcast %223 : vector<1x4xf32> to vector<8x4xf32>
    %226 = arith.mulf %224, %225 : vector<8x4xf32>
    %227 = arith.addf %194, %226 : vector<8x4xf32>
    %228 = vector.extract_strided_slice %152 {offsets = [7, 0], sizes = [1, 8], strides = [1, 1]} : vector<8x8xf32> to vector<1x8xf32>
    %229 = vector.broadcast %228 : vector<1x8xf32> to vector<8x8xf32>
    %230 = arith.mulf %217, %229 : vector<8x8xf32>
    %cst_25 = arith.constant dense<0.000000e+00> : vector<8xf32>
    %231 = vector.multi_reduction <add>, %230, %cst_25 [1] : vector<8x8xf32> to vector<8xf32>
    %232 = vector.shape_cast %231 : vector<8xf32> to vector<8x1xf32>
    %233 = vector.extract_strided_slice %5 {offsets = [3, 0], sizes = [1, 4], strides = [1, 1]} : vector<4x4xf32> to vector<1x4xf32>
    %234 = vector.broadcast %232 : vector<8x1xf32> to vector<8x4xf32>
    %235 = vector.broadcast %233 : vector<1x4xf32> to vector<8x4xf32>
    %236 = arith.mulf %234, %235 : vector<8x4xf32>
    %237 = arith.addf %227, %236 : vector<8x4xf32>
    %238 = tpu.concatenate %150, %237 in 0 : vector<8x4xf32>, vector<8x4xf32> -> vector<16x4xf32>
    %239 = vector.broadcast %9 : vector<1x4xf32> to vector<16x4xf32>
    %240 = arith.addf %238, %239 : vector<16x4xf32>
    %cst_26 = arith.constant dense<0.000000e+00> : vector<16xf32>
    %241 = vector.multi_reduction <add>, %240, %cst_26 [1] : vector<16x4xf32> to vector<16xf32>
    %242 = vector.shape_cast %241 : vector<16xf32> to vector<16x1xf32>
    %cst_27 = arith.constant 4.000000e+00 : f32
    %243 = vector.broadcast %cst_27 : f32 to vector<16x1xf32>
    %244 = arith.divf %242, %243 : vector<16x1xf32>
    %245 = vector.broadcast %244 : vector<16x1xf32> to vector<16x4xf32>
    %246 = arith.subf %240, %245 : vector<16x4xf32>
    %247 = arith.mulf %246, %246 : vector<16x4xf32>
    %cst_28 = arith.constant dense<0.000000e+00> : vector<16xf32>
    %248 = vector.multi_reduction <add>, %247, %cst_28 [1] : vector<16x4xf32> to vector<16xf32>
    %249 = vector.shape_cast %248 : vector<16xf32> to vector<16x1xf32>
    %cst_29 = arith.constant 4.000000e+00 : f32
    %250 = vector.broadcast %cst_29 : f32 to vector<16x1xf32>
    %251 = arith.divf %249, %250 : vector<16x1xf32>
    %cst_30 = arith.constant 9.99999974E-6 : f32
    %252 = vector.broadcast %cst_30 : f32 to vector<16x1xf32>
    %253 = arith.addf %251, %252 : vector<16x1xf32>
    %254 = math.rsqrt %253 : vector<16x1xf32>
    %255 = vector.broadcast %254 : vector<16x1xf32> to vector<16x4xf32>
    %256 = arith.mulf %246, %255 : vector<16x4xf32>
    %257 = vector.broadcast %10 : vector<1x4xf32> to vector<16x4xf32>
    %258 = arith.mulf %256, %257 : vector<16x4xf32>
    %259 = vector.broadcast %11 : vector<1x4xf32> to vector<16x4xf32>
    %260 = arith.addf %258, %259 : vector<16x4xf32>
    %cst_31 = arith.constant 0.000000e+00 : f32
    %261 = vector.broadcast %cst_31 : f32 to vector<16x4xf32>
    %262 = arith.maximumf %260, %261 : vector<16x4xf32>
    %263 = vector.extract_strided_slice %262 {offsets = [0, 0], sizes = [16, 1], strides = [1, 1]} : vector<16x4xf32> to vector<16x1xf32>
    %264 = vector.extract_strided_slice %6 {offsets = [0, 0], sizes = [1, 12], strides = [1, 1]} : vector<4x12xf32> to vector<1x12xf32>
    %265 = vector.broadcast %263 : vector<16x1xf32> to vector<16x12xf32>
    %266 = vector.broadcast %264 : vector<1x12xf32> to vector<16x12xf32>
    %267 = arith.mulf %265, %266 : vector<16x12xf32>
    %268 = vector.extract_strided_slice %262 {offsets = [0, 1], sizes = [16, 1], strides = [1, 1]} : vector<16x4xf32> to vector<16x1xf32>
    %269 = vector.extract_strided_slice %6 {offsets = [1, 0], sizes = [1, 12], strides = [1, 1]} : vector<4x12xf32> to vector<1x12xf32>
    %270 = vector.broadcast %268 : vector<16x1xf32> to vector<16x12xf32>
    %271 = vector.broadcast %269 : vector<1x12xf32> to vector<16x12xf32>
    %272 = arith.mulf %270, %271 : vector<16x12xf32>
    %273 = arith.addf %267, %272 : vector<16x12xf32>
    %274 = vector.extract_strided_slice %262 {offsets = [0, 2], sizes = [16, 1], strides = [1, 1]} : vector<16x4xf32> to vector<16x1xf32>
    %275 = vector.extract_strided_slice %6 {offsets = [2, 0], sizes = [1, 12], strides = [1, 1]} : vector<4x12xf32> to vector<1x12xf32>
    %276 = vector.broadcast %274 : vector<16x1xf32> to vector<16x12xf32>
    %277 = vector.broadcast %275 : vector<1x12xf32> to vector<16x12xf32>
    %278 = arith.mulf %276, %277 : vector<16x12xf32>
    %279 = arith.addf %273, %278 : vector<16x12xf32>
    %280 = vector.extract_strided_slice %262 {offsets = [0, 3], sizes = [16, 1], strides = [1, 1]} : vector<16x4xf32> to vector<16x1xf32>
    %281 = vector.extract_strided_slice %6 {offsets = [3, 0], sizes = [1, 12], strides = [1, 1]} : vector<4x12xf32> to vector<1x12xf32>
    %282 = vector.broadcast %280 : vector<16x1xf32> to vector<16x12xf32>
    %283 = vector.broadcast %281 : vector<1x12xf32> to vector<16x12xf32>
    %284 = arith.mulf %282, %283 : vector<16x12xf32>
    %285 = arith.addf %279, %284 : vector<16x12xf32>
    %286 = vector.broadcast %12 : vector<1x12xf32> to vector<16x12xf32>
    %287 = arith.addf %285, %286 : vector<16x12xf32>
    %c0_32 = arith.constant 0 : index
    %c0_33 = arith.constant 0 : index
    %288 = vector.load %arg5[%c0_32, %c0_33] : memref<16x12xf32, #tpu.memory_space<vmem>>, vector<16x12xf32>
    tpu.vector_store %arg5[%c0_32, %c0_33], %287 {strides = array<i32>} : memref<16x12xf32, #tpu.memory_space<vmem>>, vector<16x12xf32>,
    return
  }
  func.func @transform_0(%arg0: i32) -> (i32, i32) {
    %c0_i32 = arith.constant 0 : i32
    %c0_i32_0 = arith.constant 0 : i32
    %c0_i32_1 = arith.constant 0 : i32
    return %c0_i32, %c0_i32_0 : i32, i32
  }
  func.func @transform_1(%arg0: i32) -> (i32, i32) {
    %c0_i32 = arith.constant 0 : i32
    %c0_i32_0 = arith.constant 0 : i32
    %c0_i32_1 = arith.constant 0 : i32
    return %c0_i32, %c0_i32_0 : i32, i32
  }
  func.func @transform_2(%arg0: i32) -> (i32, i32) {
    %c0_i32 = arith.constant 0 : i32
    %c0_i32_0 = arith.constant 0 : i32
    %c0_i32_1 = arith.constant 0 : i32
    return %c0_i32, %c0_i32_0 : i32, i32
  }
  func.func @transform_3(%arg0: i32) -> (i32, i32) {
    %c0_i32 = arith.constant 0 : i32
    %c0_i32_0 = arith.constant 0 : i32
    %c0_i32_1 = arith.constant 0 : i32
    return %c0_i32, %c0_i32_0 : i32, i32
  }
  func.func @transform_4(%arg0: i32) -> (i32, i32) {
    %c0_i32 = arith.constant 0 : i32
    %c0_i32_0 = arith.constant 0 : i32
    %c0_i32_1 = arith.constant 0 : i32
    return %c0_i32, %c0_i32_0 : i32, i32
  }
}

</mosaic_0001>

<bundles_post_ra>
// kernel: transformer_block.1
= control target key start
LH: loop header
LB: loop body
LE: loop exit
PB: predicated region body
PF: predicated region fallthrough
CT: control target
= control target key end

     0   :  { %v589_v1 = vmov 0   ;;  %v590_v2 = vmov 2   ;;  %s797_s0 = inlined_call_operand.vmem [shape: f32[16,4], index: 0, kind: input, shape index: {}]   ;;  %s798_s1 = inlined_call_operand.vmem [shape: f32[4,16], index: 1, kind: input, shape index: {}]   ;;  %s799_s2 = inlined_call_operand.vmem [shape: f32[8,24], index: 2, kind: input, shape index: {}]   ;;  %s800_s3 = inlined_call_operand.vmem [shape: f32[8,16], index: 3, kind: input, shape index: {}]   ;;  %s801_s4 = inlined_call_operand.hbm [shape: f32[16,12], index: 4, kind: output, shape index: {}]  }
   0x1   :  { %v19_v0 = vld [vmem:[%s797_s0 + $0x8] sm:$0xff]  ;;  %517 = vset.pattern.permute.xlu0 %v589_v1  ;;  %519 = vset.pattern.permute.xlu1 %v590_v2 }
   0x2   :  { %9 = vsyncpa [#allocation3], 0  ;;  %30 = vperm.xlu0 %517, %v19_v0   ;;  %60 = vperm.xlu1 %519, %v19_v0   ;;  %v591_v3 = vmov 1   ;;  %v592_v4 = vmov 3   ;;  %v21_v5 = vld [vmem:[%s799_s2] sm:$0xff]  ;;  %v593_v6 = vmov 20   ;;  %v33_v12 = vlaneseq }
   0x3   :  { %v594_v7 = vmov 21   ;;  %v646_v8 = vld [vmem:[%s800_s3] sm:$0xff]  ;;  %v595_v9 = vmov 22   ;;  %v596_v10 = vmov 15   ;;  %v597_v11 = vmov 23   ;;  %s599_s22 = smov 4  }
   0x4   :  { %v651_v13 = vshrl.u32 %v33_v12, 7  ;;  %v18_v35 = vld [vmem:[%s797_s0] sm:$0xff]  ;;  %vm255_vm0 = vcmask 130112   ;;  %vm160_vm1 = vcmask 64512   ;;  %s600_s23 = smov 124   ;;  %vm355_vm2 = vcmask 31744  }
   0x5   :  { %v20_v36 = vld [vmem:[%s798_s1] sm:$0xf]  ;;  %s598_s1 = smov 120   ;;  %s605_s24 = smov 8   ;;  %vm479_vm3 = vcmask 97280  }
   0x6   :  { %518 = vset.pattern.permute.xlu0 %v591_v3  ;;  %520 = vset.pattern.permute.xlu1 %v592_v4  ;;  %v35_v14 = vsub.s32 0, %v651_v13  ;;  %v655_v15 = vsub.s32 1, %v651_v13  ;;  %v658_v17 = vsub.s32 2, %v651_v13  ;;  %v661_v19 = vsub.s32 3, %v651_v13  ;;  %s606_s25 = smov [#allocation2]  }
   0x7   :  { %44 = vperm.xlu0 %518, %v19_v0   ;;  %76 = vperm.xlu1 %520, %v19_v0   ;;  %s487_s26 = sshll.u32 %s606_s25, 4  ;;  %s488_s26 = int_to_ptr.vmem [resolvable:$true] %s487_s26 }
   0x8   :  { %v663_v20 = vrot.slane %v21_v5, %v35_v14  ;;  %v666_v21 = vrot.slane %v21_v5, %v655_v15  ;;  %v669_v22 = vrot.slane %v21_v5, %v658_v17  ;;  %v672_v23 = vrot.slane %v21_v5, %v661_v19  ;;  %s565_s27 = scalar_lea.vmem %s488_s26, 256  ;;  %p570_p1 = scmp.lt.s32.totalorder %s488_s26, %s488_s26 }
   0x9   :  { %v679_v31 = vrot.slane %v646_v8, %v35_v14  ;;  %v101_v38 = vrot.slane %v20_v36, %v35_v14  ;;  %v110_v39 = vrot.slane %v20_v36, %v655_v15  ;;  %v120_v43 = vrot.slane %v20_v36, %v658_v17  ;;  %p566_p0 = scmp.ne.s32.totalorder %s488_s26, %s565_s27  ;;  %p571_p2 = scmp.lt.s32.totalorder %s565_s27, %s565_s27 }
   0xa   :  { %v130_v47 = vrot.slane %v20_v36, %v661_v19 }
   0xb   :  { %521 = vset.pattern.permute.xlu1 %v593_v6  ;;  %522 = vset.pattern.permute.xlu0 %v594_v7  ;;  %p572_p3 = por %p571_p2, %p570_p1 }
   0xc   :  { %95 = vperm.xlu1 %521, %v21_v5   ;;  %104 = vperm.xlu0 %522, %v21_v5  }
   0xd   :  { %p573_p4 = pnand %p572_p3, %p566_p0 }
  0x10   :  { %523 = vset.pattern.permute.xlu1 %v595_v9  ;;  %525 = vset.pattern.permute.xlu0 %v596_v10 }
  0x11   :  { %114 = vperm.xlu1 %523, %v21_v5   ;;  %135 = vperm.xlu0 %525, %v646_v8  }
  0x15   :  { %524 = vset.pattern.permute.xlu1 %v597_v11  ;;  %528 = vset.pattern.permute.xlu0 %v590_v2 }
  0x16   :  { %124 = vperm.xlu1 %524, %v21_v5  }
  0x1a   :  { %526 = vset.pattern.permute.xlu1 %v589_v1 }
  0x81   :  { %v31_v16 = vpop.permute.xlu0 %30  ;;  %v61_v18 = vpop.permute.xlu1 %60 }
  0x82   :  { %v38_v26 = vmul.f32 %v663_v20, %v31_v16  ;;  %v68_v28 = vmul.f32 %v669_v22, %v61_v18 }
  0x86   :  { %v45_v24 = vpop.permute.xlu0 %44  ;;  %v77_v25 = vpop.permute.xlu1 %76 }
  0x87   :  { %v52_v27 = vmul.f32 %v666_v21, %v45_v24  ;;  %v84_v30 = vmul.f32 %v672_v23, %v77_v25 }
  0x89   :  { %v54_v29 = vadd.f32 %v52_v27, %v38_v26 }
  0x8b   :  { %v70_v32 = vadd.f32 %v68_v28, %v54_v29  ;;  %v96_v37 = vpop.permute.xlu1 %95  ;;  %v105_v40 = vpop.permute.xlu0 %104 }
  0x8c   :  { %v102_v42 = vmul.f32 %v101_v38, %v96_v37  ;;  %v111_v44 = vmul.f32 %v110_v39, %v105_v40 }
  0x8d   :  { %v86_v33 = vadd.f32 %v84_v30, %v70_v32 }
  0x8e   :  { %v112_v46 = vadd.f32 %v111_v44, %v102_v42 }
  0x8f   :  { %v92_v34 = vadd.f32 %v679_v31, %v86_v33 }
  0x90   :  { %v115_v41 = vpop.permute.xlu1 %114  ;;  %v136_v52 = vpop.permute.xlu0 %135 }
  0x91   :  { %291 = vperm.xlu0 %528, %v92_v34   ;;  %244 = vperm.xlu1 %526, %v92_v34   ;;  %v121_v45 = vmul.f32 %v120_v43, %v115_v41 }
  0x93   :  { %v122_v50 = vadd.f32 %v121_v45, %v112_v46 }
  0x95   :  { %527 = vset.pattern.permute.xlu1 %v591_v3  ;;  %531 = vset.pattern.permute.xlu0 %v591_v3  ;;  %v125_v48 = vpop.permute.xlu1 %124 }
  0x96   :  { %249 = vperm.xlu1 %527, %v92_v34   ;;  %40 = vperm.xlu0 %531, %v18_v35   ;;  %v131_v49 = vmul.f32 %v130_v47, %v125_v48 }
  0x98   :  { %v132_v51 = vadd.f32 %v131_v49, %v122_v50 }
  0x9a   :  { %529 = vset.pattern.permute.xlu1 %v592_v4  ;;  %534 = vset.pattern.permute.xlu0 %v589_v1  ;;  %v699_v53 = vadd.f32 %v136_v52, %v132_v51 }
  0x9b   :  { %296 = vperm.xlu1 %529, %v92_v34  }
  0x9c   :  { %v147_v55 = vrot.slane %v699_v53, %v35_v14  ;;  %v156_v56 = vrot.slane %v699_v53, %v655_v15  ;;  %v198_v62 = vrot.slane %v699_v53, %v658_v17  ;;  %v207_v63 = vrot.slane %v699_v53, %v661_v19 }
  0x9f   :  { %530 = vset.pattern.permute.xlu1 %v589_v1 }
  0xa0   :  { %25 = vperm.xlu1 %530, %v18_v35  }
  0xa4   :  { %532 = vset.pattern.permute.xlu1 %v590_v2 }
  0xa5   :  { %56 = vperm.xlu1 %532, %v18_v35  }
  0xa9   :  { %533 = vset.pattern.permute.xlu1 %v592_v4 }
  0xaa   :  { %72 = vperm.xlu1 %533, %v18_v35  }
  0xae   :  { %535 = vset.pattern.permute.xlu1 %v591_v3 }
 0x110   :  { %v245_v54 = vpop.permute.xlu1 %244  ;;  %v292_v60 = vpop.permute.xlu0 %291 }
 0x111   :  { %v247_v58 = vmul.f32 %v245_v54, %v147_v55  ;;  %v294_v3 = vmul.f32 %v292_v60, %v198_v62 }
 0x115   :  { %v250_v57 = vpop.permute.xlu1 %249  ;;  %v41_v9 = vpop.permute.xlu0 %40 }
 0x116   :  { %v252_v59 = vmul.f32 %v250_v57, %v156_v56  ;;  %v51_v14 = vmul.f32 %v666_v21, %v41_v9 }
 0x118   :  { %v253_v61 = vadd.f32 %v252_v59, %v247_v58 }
 0x11a   :  { %v297_v0 = vpop.permute.xlu1 %296  ;;  %v254_v1 = vmul.f32 0.70710677, %v253_v61 }
 0x11b   :  { %v299_v5 = vmul.f32 %v297_v0, %v207_v63 }
 0x11c   :  { %v256_v6 = vsel %vm255_vm0, %v254_v1, -inf }
 0x11d   :  { %v300_v7 = vadd.f32 %v299_v5, %v294_v3  ;;  %257 = vmax.xlane.f32.xlu0 %v256_v6  ;;  %v183_v6 = vsub.s32 5, %v651_v13 }
 0x11f   :  { %v301_v10 = vmul.f32 0.70710677, %v300_v7  ;;  %v26_v11 = vpop.permute.xlu1 %25  ;;  %v174_v7 = vsub.s32 4, %v651_v13 }
 0x120   :  { %v37_v12 = vmul.f32 %v663_v20, %v26_v11 }
 0x121   :  { %v302_v16 = vsel %vm255_vm0, %v301_v10, -inf }
 0x122   :  { %303 = vmax.xlane.f32.xlu1 %v302_v16  ;;  %v53_v18 = vadd.f32 %v51_v14, %v37_v12  ;;  %v175_v12 = vrot.slane %v699_v53, %v174_v7  ;;  %v224_v14 = vsub.s32 6, %v651_v13 }
 0x124   :  { %v57_v24 = vpop.permute.xlu1 %56 }
 0x125   :  { %v67_v25 = vmul.f32 %v669_v22, %v57_v24 }
 0x127   :  { %v69_v26 = vadd.f32 %v67_v25, %v53_v18  ;;  %v225_v25 = vrot.slane %v699_v53, %v224_v14 }
 0x129   :  { %v73_v27 = vpop.permute.xlu1 %72 }
 0x12a   :  { %v83_v28 = vmul.f32 %v672_v23, %v73_v27  ;;  %v234_v27 = vsub.s32 7, %v651_v13 }
 0x12c   :  { %v85_v29 = vadd.f32 %v83_v28, %v69_v26 }
 0x12e   :  { %v91_v30 = vadd.f32 %v679_v31, %v85_v29  ;;  %v235_v29 = vrot.slane %v699_v53, %v234_v27 }
 0x133   :  { %150 = vperm.xlu1 %535, %v91_v30   ;;  %141 = vperm.xlu0 %534, %v91_v30  }
 0x137   :  { %536 = vset.pattern.permute.xlu1 %v590_v2 }
 0x138   :  { %192 = vperm.xlu1 %536, %v91_v30  }
 0x13c   :  { %537 = vset.pattern.permute.xlu1 %v592_v4 }
 0x13d   :  { %201 = vperm.xlu1 %537, %v91_v30  }
 0x1aa   :  { %v258_v32 = vpop.xlane.xlu0 %257 }
 0x1ab   :  { %v259_v33 = vsub.f32 %v254_v1, %v258_v32 }
 0x1ad   :  { %v260_v34 = vmul.f32 1.442695, %v259_v33 }
 0x1af   :  { %545 = vpow2.f32 %v260_v34  ;;  %v304_v35 = vpop.xlane.xlu1 %303 }
 0x1b0   :  { %v305_v36 = vsub.f32 %v301_v10, %v304_v35  ;;  %v184_v10 = vrot.slane %v699_v53, %v183_v6 }
 0x1b2   :  { %v306_v37 = vmul.f32 1.442695, %v305_v36  ;;  %v142_v45 = vpop.permute.xlu0 %141 }
 0x1b3   :  { %v151_v38 = vpop.permute.xlu1 %150  ;;  %v148_v46 = vmul.f32 %v147_v55, %v142_v45 }
 0x1b4   :  { %547 = vpow2.f32 %v306_v37  ;;  %v157_v47 = vmul.f32 %v156_v56, %v151_v38 }
 0x1b6   :  { %v158_v48 = vadd.f32 %v157_v47, %v148_v46 }
 0x1b7   :  { %v193_v39 = vpop.permute.xlu1 %192 }
 0x1b8   :  { %v199_v2 = vmul.f32 %v198_v62, %v193_v39  ;;  %v159_v49 = vmul.f32 0.70710677, %v158_v48 }
 0x1b9   :  { %v546_v40 = vpop.eup %545 }
 0x1ba   :  { %263 = vrot.lane.b32.xlu1 %v546_v40, %s598_s1  ;;  %v161_v50 = vsel %vm160_vm1, %v159_v49, -inf }
 0x1bc   :  { %v202_v31 = vpop.permute.xlu1 %201 }
 0x1bd   :  { %v208_v41 = vmul.f32 %v207_v63, %v202_v31 }
 0x1be   :  { %v548_v42 = vpop.eup %547 }
 0x1bf   :  { %v209_v4 = vadd.f32 %v208_v41, %v199_v2  ;;  %309 = vrot.lane.b32.xlu1 %v548_v42, %s598_s1 }
 0x1c1   :  { %v210_v43 = vmul.f32 0.70710677, %v209_v4  ;;  %v340_v4 = vrot.slane %v646_v8, %v655_v15 }
 0x1c3   :  { %v211_v44 = vsel %vm160_vm1, %v210_v43, -inf }
 0x1c4   :  { %212 = vmax.xlane.f32.xlu0 %v211_v44 }
 0x1e3   :  { %162 = vmax.xlane.f32.xlu1 %v161_v50 }
 0x22c   :  { %v264_v51 = vpop.permute.xlu1 %263 }
 0x22d   :  { %v266_v52 = vsel %vm160_vm1, %v264_v51, 0.0 }
 0x22e   :  { %267 = vadd.xlane.f32.xlu1 %v266_v52 }
 0x231   :  { %v310_v54 = vpop.permute.xlu1 %309 }
 0x232   :  { %v312_v57 = vsel %vm160_vm1, %v310_v54, 0.0 }
 0x233   :  { %313 = vadd.xlane.f32.xlu0 %v312_v57 }
 0x251   :  { %v213_v58 = vpop.xlane.xlu0 %212 }
 0x252   :  { %v214_v59 = vsub.f32 %v210_v43, %v213_v58 }
 0x254   :  { %v215_v60 = vmul.f32 1.442695, %v214_v59 }
 0x256   :  { %549 = vpow2.f32 %v215_v60 }
 0x260   :  { %v550_v61 = vpop.eup %549 }
 0x261   :  { %v217_v55 = vsel %vm160_vm1, %v550_v61, 0.0 }
 0x262   :  { %218 = vadd.xlane.f32.xlu0 %v217_v55 }
 0x270   :  { %v163_v56 = vpop.xlane.xlu1 %162 }
 0x271   :  { %v164_v62 = vsub.f32 %v159_v49, %v163_v56 }
 0x273   :  { %v165_v63 = vmul.f32 1.442695, %v164_v62 }
 0x275   :  { %551 = vpow2.f32 %v165_v63 }
 0x27f   :  { %v552_v0 = vpop.eup %551 }
 0x280   :  { %v167_v1 = vsel %vm160_vm1, %v552_v0, 0.0 }
 0x281   :  { %168 = vadd.xlane.f32.xlu1 %v167_v1 }
 0x2bb   :  { %v268_v3 = vpop.xlane.xlu1 %267 }
 0x2bc   :  { %553 = vrcp.f32 %v268_v3 }
 0x2c0   :  { %v314_v5 = vpop.xlane.xlu0 %313 }
 0x2c1   :  { %555 = vrcp.f32 %v314_v5 }
 0x2c6   :  { %v554_v9 = vpop.eup %553 }
 0x2c7   :  { %v270_v11 = vmul.f32 %v554_v9, %v546_v40 }
 0x2c9   :  { %v280_v16 = vmul.f32 %v270_v11, %v184_v10  ;;  %v271_v18 = vmul.f32 %v270_v11, %v175_v12 }
 0x2cb   :  { %v556_v24 = vpop.eup %555  ;;  %282 = vrot.lane.b32.xlu0 %v280_v16, %s598_s1  ;;  %273 = vrot.lane.b32.xlu1 %v271_v18, %s598_s1 }
 0x2cc   :  { %v316_v26 = vmul.f32 %v556_v24, %v548_v42 }
 0x2ce   :  { %v317_v28 = vmul.f32 %v316_v26, %v225_v25  ;;  %v327_v30 = vmul.f32 %v316_v26, %v235_v29 }
 0x2d0   :  { %319 = vrot.lane.b32.xlu1 %v317_v28, %s598_s1 }
 0x2d4   :  { %329 = vrot.lane.b32.xlu1 %v327_v30, %s598_s1 }
 0x2ef   :  { %v219_v32 = vpop.xlane.xlu0 %218 }
 0x2f0   :  { %557 = vrcp.f32 %v219_v32 }
 0x2fa   :  { %v558_v34 = vpop.eup %557 }
 0x2fb   :  { %v221_v37 = vmul.f32 %v558_v34, %v550_v61 }
 0x2fd   :  { %v226_v2 = vmul.f32 %v225_v25, %v221_v37  ;;  %v236_v41 = vmul.f32 %v235_v29, %v221_v37 }
 0x2ff   :  { %v227_v53 = vsel %vm160_vm1, %v226_v2, 0.0  ;;  %v237_v42 = vsel %vm160_vm1, %v236_v41, 0.0  ;;  %v394_v2 = vrot.slane %v646_v8, %v658_v17  ;;  %v602_v41 = vmov 6  }
 0x300   :  { %540 = vset.pattern.permute.xlu0 %v602_v41 }
 0x30e   :  { %v169_v33 = vpop.xlane.xlu1 %168 }
 0x30f   :  { %559 = vrcp.f32 %v169_v33 }
 0x319   :  { %v560_v35 = vpop.eup %559 }
 0x31a   :  { %v171_v36 = vmul.f32 %v560_v35, %v552_v0 }
 0x31c   :  { %v185_v38 = vmul.f32 %v184_v10, %v171_v36  ;;  %v176_v39 = vmul.f32 %v175_v12, %v171_v36 }
 0x31e   :  { %v186_v40 = vsel %vm160_vm1, %v185_v38, 0.0  ;;  %v177_v31 = vsel %vm160_vm1, %v176_v39, 0.0  ;;  %v404_v39 = vrot.slane %v646_v8, %v661_v19 }
 0x31f   :  { %187 = vadd.xlane.f32.xlu1 %v186_v40  ;;  %178 = vadd.xlane.f32.xlu0 %v177_v31 }
 0x323   :  { %228 = vadd.xlane.f32.xlu1 %v227_v53  ;;  %v601_v53 = vmov 4  }
 0x324   :  { %538 = vset.pattern.permute.xlu1 %v601_v53 }
 0x327   :  { %238 = vadd.xlane.f32.xlu1 %v237_v42 }
 0x338   :  { %342 = vrot.lane.b32.xlu1 %v340_v4, %s599_s22 }
 0x33d   :  { %v274_v43 = vpop.permute.xlu1 %273  ;;  %v283_v45 = vpop.permute.xlu0 %282 }
 0x33e   :  { %v276_v44 = vsel %vm160_vm1, %v274_v43, 0.0  ;;  %v285_v47 = vsel %vm160_vm1, %v283_v45, 0.0 }
 0x33f   :  { %277 = vadd.xlane.f32.xlu0 %v276_v44 }
 0x342   :  { %v320_v46 = vpop.permute.xlu1 %319 }
 0x343   :  { %286 = vadd.xlane.f32.xlu0 %v285_v47  ;;  %v322_v48 = vsel %vm160_vm1, %v320_v46, 0.0 }
 0x346   :  { %v330_v49 = vpop.permute.xlu1 %329 }
 0x347   :  { %323 = vadd.xlane.f32.xlu0 %v322_v48  ;;  %v332_v50 = vsel %vm160_vm1, %v330_v49, 0.0 }
 0x34b   :  { %333 = vadd.xlane.f32.xlu0 %v332_v50 }
 0x3ac   :  { %v179_v15 = vpop.xlane.xlu0 %178  ;;  %v188_v51 = vpop.xlane.xlu1 %187 }
 0x3ad   :  { %v180_v52 = vmul.f32 %v179_v15, %v663_v20  ;;  %v189_v54 = vmul.f32 %v188_v51, %v666_v21 }
 0x3af   :  { %v190_v59 = vadd.f32 %v189_v54, %v180_v52  ;;  %v603_v52 = vmov 5  }
 0x3b0   :  { %v229_v57 = vpop.xlane.xlu1 %228 }
 0x3b1   :  { %v230_v58 = vmul.f32 %v229_v57, %v669_v22 }
 0x3b3   :  { %v231_v61 = vadd.f32 %v230_v58, %v190_v59 }
 0x3b4   :  { %v239_v60 = vpop.xlane.xlu1 %238 }
 0x3b5   :  { %v240_v55 = vmul.f32 %v239_v60, %v672_v23  ;;  %v604_v60 = vmov 7  }
 0x3b7   :  { %v241_v56 = vadd.f32 %v240_v55, %v231_v61  ;;  %v464_v61 = vrot.slane %v646_v8, %v174_v7 }
 0x3b8   :  { %v343_v62 = vpop.permute.xlu1 %342 }
 0x3b9   :  { %v345_v63 = vadd.f32 %v343_v62, %v241_v56 }
 0x3bb   :  { %349 = vrot.lane.b32.xlu0 %v345_v63, %s600_s23 }
 0x3cc   :  { %v278_v0 = vpop.xlane.xlu0 %277 }
 0x3cd   :  { %v279_v6 = vmul.f32 %v278_v0, %v663_v20 }
 0x3d0   :  { %v287_v1 = vpop.xlane.xlu0 %286 }
 0x3d1   :  { %v288_v3 = vmul.f32 %v287_v1, %v666_v21 }
 0x3d3   :  { %v289_v10 = vadd.f32 %v288_v3, %v279_v6 }
 0x3d4   :  { %v324_v5 = vpop.xlane.xlu0 %323 }
 0x3d5   :  { %v325_v9 = vmul.f32 %v324_v5, %v669_v22 }
 0x3d7   :  { %v326_v12 = vadd.f32 %v325_v9, %v289_v10 }
 0x3d8   :  { %v334_v11 = vpop.xlane.xlu0 %333 }
 0x3d9   :  { %v335_v14 = vmul.f32 %v334_v11, %v672_v23 }
 0x3db   :  { %v336_v16 = vadd.f32 %v335_v14, %v326_v12 }
 0x3dd   :  { %v346_v18 = vadd.f32 %v343_v62, %v336_v16 }
 0x3df   :  { %351 = vrot.lane.b32.xlu1 %v346_v18, %s600_s23 }
 0x42d   :  { %v350_v24 = vpop.permute.xlu0 %349 }
 0x42e   :  { %v356_v25 = vsel %vm355_vm2, %v350_v24, 0.0 }
 0x42f   :  { %357 = vadd.xlane.f32.xlu1 %v356_v25 }
 0x451   :  { %v352_v26 = vpop.permute.xlu1 %351 }
 0x452   :  { %v359_v27 = vsel %vm355_vm2, %v352_v26, 0.0 }
 0x453   :  { %360 = vadd.xlane.f32.xlu0 %v359_v27 }
 0x4bc   :  { %v358_v28 = vpop.xlane.xlu1 %357 }
 0x4bd   :  { %v363_v29 = vmul.f32 0.25, %v358_v28 }
 0x4bf   :  { %v365_v30 = vsub.f32 %v345_v63, %v363_v29 }
 0x4c1   :  { %v367_v32 = vmul.f32 %v365_v30, %v365_v30 }
 0x4c3   :  { %371 = vrot.lane.b32.xlu0 %v367_v32, %s600_s23 }
 0x4e0   :  { %v361_v33 = vpop.xlane.xlu0 %360 }
 0x4e1   :  { %v364_v34 = vmul.f32 0.25, %v361_v33 }
 0x4e3   :  { %v366_v35 = vsub.f32 %v346_v18, %v364_v34 }
 0x4e5   :  { %v368_v36 = vmul.f32 %v366_v35, %v366_v35 }
 0x4e7   :  { %373 = vrot.lane.b32.xlu1 %v368_v36, %s600_s23 }
 0x535   :  { %v372_v37 = vpop.permute.xlu0 %371 }
 0x536   :  { %v377_v38 = vsel %vm355_vm2, %v372_v37, 0.0 }
 0x537   :  { %378 = vadd.xlane.f32.xlu1 %v377_v38 }
 0x548   :  { %406 = vrot.lane.b32.xlu1 %v404_v39, %s599_s22 }
 0x559   :  { %v374_v40 = vpop.permute.xlu1 %373 }
 0x55a   :  { %v380_v31 = vsel %vm355_vm2, %v374_v40, 0.0 }
 0x55b   :  { %381 = vadd.xlane.f32.xlu0 %v380_v31 }
 0x571   :  { %396 = vrot.lane.b32.xlu0 %v394_v2, %s599_s22 }
 0x5c4   :  { %v379_v42 = vpop.xlane.xlu1 %378 }
 0x5c5   :  { %v383_v4 = vmul.f32 0.25, %v379_v42 }
 0x5c7   :  { %v385_v43 = vadd.f32 1e-05, %v383_v4 }
 0x5c8   :  { %v407_v49 = vpop.permute.xlu1 %406 }
 0x5c9   :  { %561 = vrsqrt.f32 %v385_v43 }
 0x5d3   :  { %v562_v19 = vpop.eup %561 }
 0x5d4   :  { %v389_v47 = vmul.f32 %v562_v19, %v365_v30 }
 0x5e8   :  { %v382_v44 = vpop.xlane.xlu0 %381 }
 0x5e9   :  { %v384_v45 = vmul.f32 0.25, %v382_v44 }
 0x5eb   :  { %v386_v46 = vadd.f32 1e-05, %v384_v45 }
 0x5ec   :  { %v397_v48 = vpop.permute.xlu0 %396 }
 0x5ed   :  { %563 = vrsqrt.f32 %v386_v46  ;;  %v399_v50 = vmul.f32 %v397_v48, %v389_v47 }
 0x5ef   :  { %v409_v17 = vadd.f32 %v407_v49, %v399_v50 }
 0x5f1   :  { %v411_v15 = vmax.f32 %v409_v17, 0.0 }
 0x5f3   :  { %438 = vperm.xlu0 %540, %v411_v15   ;;  %415 = vperm.xlu1 %538, %v411_v15  }
 0x5f7   :  { %v564_v51 = vpop.eup %563  ;;  %539 = vset.pattern.permute.xlu1 %v603_v52  ;;  %541 = vset.pattern.permute.xlu0 %v601_v53 }
 0x5f8   :  { %v390_v54 = vmul.f32 %v564_v51, %v366_v35  ;;  %426 = vperm.xlu1 %539, %v411_v15  }
 0x5fa   :  { %v400_v57 = vmul.f32 %v397_v48, %v390_v54 }
 0x5fc   :  { %v410_v58 = vadd.f32 %v407_v49, %v400_v57 }
 0x5fe   :  { %v412_v59 = vmax.f32 %v410_v58, 0.0 }
 0x600   :  { %420 = vperm.xlu0 %541, %v412_v59   ;;  %430 = vperm.xlu1 %539, %v412_v59  }
 0x604   :  { %544 = vset.pattern.permute.xlu0 %v604_v60  ;;  %542 = vset.pattern.permute.xlu1 %v602_v41 }
 0x605   :  { %454 = vperm.xlu0 %544, %v412_v59   ;;  %442 = vperm.xlu1 %542, %v412_v59  }
 0x609   :  { %543 = vset.pattern.permute.xlu1 %v604_v60 }
 0x60a   :  { %450 = vperm.xlu1 %543, %v411_v15  }
 0x60e   :  { %466 = vrot.lane.b32.xlu1 %v464_v61, %s605_s24 }
 0x672   :  { %v416_v55 = vpop.permute.xlu1 %415  ;;  %v439_v56 = vpop.permute.xlu0 %438 }
 0x673   :  { %v423_v6 = vmul.f32 %v416_v55, %v663_v20  ;;  %v445_v11 = vmul.f32 %v439_v56, %v669_v22 }
 0x677   :  { %v427_v62 = vpop.permute.xlu1 %426 }
 0x678   :  { %v433_v1 = vmul.f32 %v427_v62, %v666_v21 }
 0x67a   :  { %v435_v8 = vadd.f32 %v433_v1, %v423_v6 }
 0x67c   :  { %v447_v18 = vadd.f32 %v445_v11, %v435_v8 }
 0x67f   :  { %v421_v63 = vpop.permute.xlu0 %420  ;;  %v431_v0 = vpop.permute.xlu1 %430 }
 0x680   :  { %v424_v3 = vmul.f32 %v421_v63, %v663_v20  ;;  %v434_v5 = vmul.f32 %v431_v0, %v666_v21 }
 0x682   :  { %v436_v7 = vadd.f32 %v434_v5, %v424_v3 }
 0x684   :  { %v443_v9 = vpop.permute.xlu1 %442  ;;  %v455_v10 = vpop.permute.xlu0 %454 }
 0x685   :  { %v446_v13 = vmul.f32 %v443_v9, %v669_v22  ;;  %v458_v16 = vmul.f32 %v455_v10, %v672_v23 }
 0x687   :  { %v448_v12 = vadd.f32 %v446_v13, %v436_v7 }
 0x689   :  { %v451_v14 = vpop.permute.xlu1 %450  ;;  %v460_v26 = vadd.f32 %v458_v16, %v448_v12 }
 0x68a   :  { %v457_v24 = vmul.f32 %v451_v14, %v672_v23 }
 0x68c   :  { %v459_v25 = vadd.f32 %v457_v24, %v447_v18 }
 0x68d   :  { %v467_v21 = vpop.permute.xlu1 %466 }
 0x68e   :  { %v469_v27 = vadd.f32 %v467_v21, %v459_v25  ;;  %v470_v20 = vadd.f32 %v467_v21, %v460_v26 }
 0x690   :  { %475 = vrot.lane.b32.xlu0 %v470_v20, %s598_s1  ;;  %473 = vrot.lane.b32.xlu1 %v469_v27, %s598_s1 }
 0x702   :  { %v476_v22 = vpop.permute.xlu0 %475  ;;  %v474_v28 = vpop.permute.xlu1 %473 }
 0x703   :  { %481 = vst.msk [vmem:[#allocation2 + $0x8] sm:$0xff] %vm479_vm3, %v476_v22  ;;  %480 = vst.msk [vmem:[#allocation2] sm:$0xff] %vm479_vm3, %v474_v28 }
 0x704   :  { %576 = shalt.err (!%p573_p4)
}
 0x705   :  { %s577_s30 = scalar_lea.hbm %s801_s4, 256 }
 0x706   :  { %p578_p5 = scmp.ne.s32.totalorder %s801_s4, %s577_s30  ;;  %p581_p6 = scmp.lt.u32.totalorder %s577_s30, %s801_s4 }
 0x708   :  { %p583_p7 = pnand %p581_p6, %p578_p5 }
 0x70a   :  { %586 = shalt.err (!%p583_p7)
}
 0x70b   :  { %s607_s9 = smov 128  }
 0x70c   :  { %493 = dma.vmem_to_hbm [thread:$0]  %s488_s26, 256, %s801_s4, [#allocation3], %s607_s9, %s607_s9, %s605_s24  }
 0x70d   :  { %587 = dma.done.wait [#allocation3], 256  }
 0x70e   :  { %588 = vsyncadd [#allocation3], 4294967040 }
 0x70f   :  { %497 = vsyncpa [#allocation3], 1 }

</bundles_post_ra>
